<compile_context>
chip_gen: v7x
topology: tpu7x:2x2x1
jax: 0.10.0
libtpu: 0.0.40
codegen_flags: <defaults>
</compile_context>

<pallas_src>
import functools

import jax
import jax.numpy as jnp
from jax import lax
from jax.experimental import pallas as pl
from jax.experimental.pallas import tpu as pltpu


def _patch_embed_kernel(xp_ref, wt_ref, add_ref, o_ref):
    # xp_ref : (R, Kp)  bf16  patch rows; R = Bt*(Np+1), row 0 of each image is zero
    # wt_ref : (Kp, Ep) bf16  conv weight, pre-transposed / padded (grid-invariant)
    # add_ref: (R, Ep)  f32   fused bias + class token + positional embedding
    # o_ref  : (R, Ep)        output tokens; one aligned lane-dense store
    proj = jnp.dot(xp_ref[...], wt_ref[...], preferred_element_type=jnp.float32)
    o_ref[...] = (proj + add_ref[...]).astype(o_ref.dtype)


def _round_up(n, m):
    return (n + m - 1) // m * m


def _pick_batch_tile(B, T, Kp, Ep, out_itemsize,
                     vmem_budget=40 * 1024 * 1024, target_rows=256):
    """Images per grid step: fill the MXU M dimension, keep >= 2 parallel grid
    steps (megacore / v7x 2-TC sharding), stay inside the VMEM budget."""
    best = 1
    for bt in range(1, B + 1):
        if B % bt:
            continue
        if B >= 2 and B // bt < 2:
            break                         # keep >= 2 parallel steps per chip
        rows = bt * T
        tile_bytes = 2 * rows * (Kp * 2 + Ep * out_itemsize)   # 2x double buffering
        if tile_bytes > vmem_budget:
            break
        best = bt
        if rows >= target_rows:
            break
    return best


@functools.partial(jax.jit, static_argnames=("patch_size",))
def patch_embedding_forward(x, conv_w, conv_b, class_token, pos_embedding, *,
                            patch_size):
    """x: (B, C, H, W); conv_w: (E, C, P, P); conv_b: (E,);
    class_token: (1, 1, E); pos_embedding: (1, Np+1, E)."""
    B, C, H, W = x.shape
    P = patch_size
    E = conv_w.shape[0]
    assert H % P == 0 and W % P == 0, "image size must be divisible by patch size"
    Hp, Wp = H // P, W // P
    Np = Hp * Wp
    T = Np + 1
    K = C * P * P
    Kp = _round_up(K, 128)        # full-width MXU passes / aligned lane loads
    Ep = _round_up(E, 128)        # unmasked lane-dense output stores

    out_dtype = x.dtype
    out_itemsize = jnp.dtype(out_dtype).itemsize

    # ---- im2row (inherent to patchifying NCHW input), fused by XLA under jit:
    # cast -> transpose -> pad is one producer fusion, so x is read once and the
    # patch matrix is written once in bf16 (half the bytes of an f32 im2row).
    xb = x.astype(jnp.bfloat16)
    xp = xb.reshape(B, C, Hp, P, Wp, P)
    xp = jnp.transpose(xp, (0, 2, 4, 1, 3, 5)).reshape(B, Np, K)
    # Prepend a zero row per image (class-token slot) and zero-pad K -> Kp so the
    # kernel does a single (R, Kp) @ (Kp, Ep) matmul and one aligned store.
    xp = jnp.pad(xp, ((0, 0), (1, 0), (0, Kp - K)))            # (B, T, Kp)

    # ---- grid-invariant operands (constant index_maps -> VMEM-resident).
    wt = conv_w.reshape(E, K).T.astype(jnp.bfloat16)           # (K, E)
    wt = jnp.pad(wt, ((0, Kp - K), (0, Ep - E)))               # (Kp, Ep)

    # Fused additive tensor: add[0] = cls + pos[0]; add[1:] = bias + pos[1:].
    add = pos_embedding.reshape(T, E).astype(jnp.float32)
    add = add.at[0].add(class_token.reshape(E).astype(jnp.float32))
    add = add.at[1:].add(conv_b.reshape(1, E).astype(jnp.float32))
    add = jnp.pad(add, ((0, 0), (0, Ep - E)))                  # (T, Ep)

    # ---- pack Bt images per grid step (raise MXU M, amortize per-step cost).
    Bt = _pick_batch_tile(B, T, Kp, Ep, out_itemsize)
    G = B // Bt
    R = Bt * T
    xp_g = xp.reshape(G, R, Kp)          # leading-dim merge only (free)
    add_g = jnp.tile(add, (Bt, 1))       # (R, Ep), small, resident

    # ---- explicit VMEM budget (v7x has only 64 MiB physical VMEM).
    tile_bytes = 2 * R * (Kp * 2 + Ep * out_itemsize)          # double-buffered in/out
    resident_bytes = 2 * (Kp * Ep * 2 + R * Ep * 4)            # weight + add (allow 2x)
    vmem_limit = int(min(max((tile_bytes + resident_bytes) * 5 // 4,
                             16 * 1024 * 1024), 48 * 1024 * 1024))
    # TODO(synk): for very large images (Np so big that even Bt=1 exceeds the
    # budget) add an inner M-tile grid axis over Np instead of one maximal tile.

    out_g = pl.pallas_call(
        _patch_embed_kernel,
        out_shape=jax.ShapeDtypeStruct((G, R, Ep), out_dtype),
        grid=(G,),
        in_specs=[
            pl.BlockSpec((None, R, Kp), lambda g: (g, 0, 0)),  # patch rows
            pl.BlockSpec((Kp, Ep), lambda g: (0, 0)),          # weight (resident)
            pl.BlockSpec((R, Ep), lambda g: (0, 0)),           # additive (resident)
        ],
        out_specs=pl.BlockSpec((None, R, Ep), lambda g: (g, 0, 0)),
        compiler_params=pltpu.CompilerParams(
            dimension_semantics=("parallel",),
            vmem_limit_bytes=vmem_limit,
        ),
    )(xp_g, wt, add_g)

    out = out_g.reshape(B, T, Ep)
    if Ep != E:
        out = out[:, :, :E]   # only pays a copy in misaligned (tiny-E) configs
    # TODO(synk): emb_dropout is applied as eval-mode identity; training-mode
    # dropout would use pltpu.prng_seed / pltpu.prng_random_bits in-kernel.
    return out


if __name__ == "__main__":
    # Small shapes consistent with the module: B=4, C=3, img=32, patch=16,
    # emb_dim=32 -> Np = 4 patches, 5 tokens; 2 images packed per grid step.
    B, C, IMG, P, E = 4, 3, 32, 16, 32
    Np = (IMG // P) ** 2
    T = Np + 1
    fan_in = C * P * P

    key = jax.random.PRNGKey(0)
    kx, kw, kb, kc, kp = jax.random.split(key, 5)

    x = jax.random.normal(kx, (B, C, IMG, IMG), dtype=jnp.float32)

    # Conv2d default init: uniform(-b, b), b = 1/sqrt(fan_in).
    bound = 1.0 / jnp.sqrt(jnp.float32(fan_in))
    conv_w = jax.random.uniform(kw, (E, C, P, P), minval=-bound, maxval=bound,
                                dtype=jnp.float32)
    conv_b = jax.random.uniform(kb, (E,), minval=-bound, maxval=bound,
                                dtype=jnp.float32)
    # trunc_normal_(std=0.02) init for class token / positional embedding.
    class_token = 0.02 * jax.random.truncated_normal(kc, -2.0, 2.0, (1, 1, E),
                                                     dtype=jnp.float32)
    pos_embedding = 0.02 * jax.random.truncated_normal(kp, -2.0, 2.0, (1, T, E),
                                                       dtype=jnp.float32)

    out = patch_embedding_forward(x, conv_w, conv_b, class_token, pos_embedding,
                                  patch_size=P)
    out = jax.block_until_ready(out)

    # Independent pure-JAX reference of the same forward pass (f32, HIGHEST).
    conv = lax.conv_general_dilated(
        x, conv_w, window_strides=(P, P), padding="VALID",
        dimension_numbers=("NCHW", "OIHW", "NCHW"),
        precision=lax.Precision.HIGHEST,
    ) + conv_b.reshape(1, E, 1, 1)                      # (B, E, Hp, Wp)
    seq = conv.reshape(B, E, Np).transpose(0, 2, 1)     # (B, Np, E)
    ref = jnp.concatenate(
        [jnp.broadcast_to(class_token, (B, 1, E)), seq], axis=1
    ) + pos_embedding                                   # (B, T, E)

    assert out.shape == (B, T, E), out.shape
    # Kernel uses bf16 matmul operands with f32 accumulation (deliberate perf
    # choice; the reference is full f32) -> documented tolerance below.
    assert jnp.allclose(out, ref, atol=2e-2, rtol=2e-2), (
        float(jnp.max(jnp.abs(out - ref))))

    print("KERNEL_OK")
</pallas_src>

<mosaic_0001>
module attributes {stable_mosaic.version = 11 : i64} {
  func.func @_patch_embed_kernel(%arg0: i32, %arg1: memref<1x10x768xbf16, #tpu.memory_space<vmem>>, %arg2: memref<768x128xbf16, #tpu.memory_space<vmem>>, %arg3: memref<10x128xf32, #tpu.memory_space<vmem>>, %arg4: memref<1x10x128xf32, #tpu.memory_space<vmem>>) attributes {dimension_semantics = [#tpu.dimension_semantics<parallel>], iteration_bounds = array<i64: 2>, scalar_prefetch = 0 : i64, scratch_operands = 0 : i64, tpu.core_type = #tpu.core_type<tc>, window_params = [{transform_indices = @transform_0, window_bounds = array<i64: 1, 10, 768>}, {pipeline_mode = #tpu.pipeline_mode<synchronous>, transform_indices = @transform_1, window_bounds = array<i64: 768, 128>}, {pipeline_mode = #tpu.pipeline_mode<synchronous>, transform_indices = @transform_2, window_bounds = array<i64: 10, 128>}, {transform_indices = @transform_3, window_bounds = array<i64: 1, 10, 128>}]} {
    %c0 = arith.constant 0 : index
    %c0_0 = arith.constant 0 : index
    %c0_1 = arith.constant 0 : index
    %0 = vector.load %arg1[%c0, %c0_0, %c0_1] : memref<1x10x768xbf16, #tpu.memory_space<vmem>>, vector<1x10x768xbf16>
    %1 = vector.shape_cast %0 : vector<1x10x768xbf16> to vector<10x768xbf16>
    %c0_2 = arith.constant 0 : index
    %c0_3 = arith.constant 0 : index
    %2 = vector.load %arg2[%c0_2, %c0_3] : memref<768x128xbf16, #tpu.memory_space<vmem>>, vector<768x128xbf16>
    %cst = arith.constant dense<0.000000e+00> : vector<10x128xf32>
    %3 = tpu.matmul %1, %2, %cst {dimension_numbers = #tpu.dot_dimension_numbers<[1], [0], [0], [1], [0, 0, 1, 1], [], []>} : vector<10x768xbf16>, vector<768x128xbf16>, vector<10x128xf32> -> vector<10x128xf32>
    %c0_4 = arith.constant 0 : index
    %c0_5 = arith.constant 0 : index
    %4 = vector.load %arg3[%c0_4, %c0_5] : memref<10x128xf32, #tpu.memory_space<vmem>>, vector<10x128xf32>
    %5 = arith.addf %3, %4 : vector<10x128xf32>
    %c0_6 = arith.constant 0 : index
    %c0_7 = arith.constant 0 : index
    %c0_8 = arith.constant 0 : index
    %6 = vector.load %arg4[%c0_6, %c0_7, %c0_8] : memref<1x10x128xf32, #tpu.memory_space<vmem>>, vector<1x10x128xf32>
    %7 = vector.shape_cast %6 : vector<1x10x128xf32> to vector<10x128xf32>
    %8 = vector.shape_cast %5 : vector<10x128xf32> to vector<1x10x128xf32>
    tpu.vector_store %arg4[%c0_6, %c0_7, %c0_8], %8 {strides = array<i32>} : memref<1x10x128xf32, #tpu.memory_space<vmem>>, vector<1x10x128xf32>,
    return
  }
  func.func @transform_0(%arg0: i32) -> (i32, i32, i32) {
    %c0_i32 = arith.constant 0 : i32
    %c0_i32_0 = arith.constant 0 : i32
    %c0_i32_1 = arith.constant 0 : i32
    return %arg0, %c0_i32, %c0_i32_0 : i32, i32, i32
  }
  func.func @transform_1(%arg0: i32) -> (i32, i32) {
    %c0_i32 = arith.constant 0 : i32
    %c0_i32_0 = arith.constant 0 : i32
    %c0_i32_1 = arith.constant 0 : i32
    return %c0_i32, %c0_i32_0 : i32, i32
  }
  func.func @transform_2(%arg0: i32) -> (i32, i32) {
    %c0_i32 = arith.constant 0 : i32
    %c0_i32_0 = arith.constant 0 : i32
    %c0_i32_1 = arith.constant 0 : i32
    return %c0_i32, %c0_i32_0 : i32, i32
  }
  func.func @transform_3(%arg0: i32) -> (i32, i32, i32) {
    %c0_i32 = arith.constant 0 : i32
    %c0_i32_0 = arith.constant 0 : i32
    %c0_i32_1 = arith.constant 0 : i32
    return %arg0, %c0_i32, %c0_i32_0 : i32, i32, i32
  }
}

</mosaic_0001>

<bundles_post_ra>
// kernel: tile.9
= control target key start
LH: loop header
LB: loop body
LE: loop exit
PB: predicated region body
PF: predicated region fallthrough
CT: control target
= control target key end

     0   :  { %s32_s0 = inlined_call_operand.vmem [shape: f32[2,5,128], index: 0, kind: input, shape index: {}]   ;;  %s33_s1 = inlined_call_operand.vmem [shape: f32[10,128], index: 1, kind: output, shape index: {}]  }
   0x1   :  { %v2_v0 = vld [vmem:[%s32_s0] sm:$0x1f]   ;;  %v8_v1 = vld [vmem:[%s32_s0 + $0x8] sm:$0x1f]  }
   0x2   :  { %3 = vst [vmem:[%s33_s1] sm:$0x1f] %v2_v0   ;;  %9 = vst [vmem:[%s33_s1 + $0x5] sm:$0x1f] %v8_v1  }

// kernel: patch_embedding_forward.1
= control target key start
LH: loop header
LB: loop body
LE: loop exit
PB: predicated region body
PF: predicated region fallthrough
CT: control target
= control target key end

     0   :  { %s999_s12 = smov 0   ;;  %s1182_s0 = inlined_call_operand.vmem [shape: bf16[2,10,768], index: 0, kind: input, shape index: {}]   ;;  %s1183_s1 = inlined_call_operand.vmem [shape: bf16[768,128], index: 1, kind: input, shape index: {}]   ;;  %s1184_s2 = inlined_call_operand.vmem [shape: f32[10,128], index: 2, kind: input, shape index: {}]   ;;  %s1185_s3 = inlined_call_operand.vmem [shape: f32[2,10,128], index: 3, kind: output, shape index: {}]  }
   0x1 LB: > { %s774_s13 = sadd.s32 4294967295, %s977_s12   ;;  %p778_p0 = scmp.ge.s32.totalorder %s977_s12, 1  ;;  %s977_s12 = sphi %s999_s12, %s13_s12  }
   0x2   : > { %p137_p1 = scmp.lt.s32.totalorder %s977_s12, 3 }
   0x4   : > { %p138_p2 = pnand %p778_p0, %p137_p1 }
   0x5   : > { %v914_v0 = vld [vmem:[%s1183_s1 + $0x40] sm:$0xff] (!%p138_p2)   ;;  %v918_v4 = vld [vmem:[%s1183_s1 + $0x48] sm:$0xff] (!%p138_p2)   ;;  %v922_v8 = vld [vmem:[%s1183_s1 + $0x50] sm:$0xff] (!%p138_p2)   ;;  %p161_p3 = scmp.lt.s32.totalorder (!%p138_p2), %s774_s13, 1 }
   0x6   : > { %141 = sbr.rel (%p138_p2) target bundleno = 290 (0x122), region = 32  ;;  %v915_v1 = vld [vmem:[%s1183_s1] sm:$0xff] (!%p138_p2)   ;;  %839 = vmatprep.subr.bf16.mxu0 (!%p138_p2), %v914_v0  ;;  %v919_v5 = vld [vmem:[%s1183_s1 + $0x8] sm:$0xff] (!%p138_p2)   ;;  %v923_v9 = vld [vmem:[%s1183_s1 + $0x10] sm:$0xff] (!%p138_p2)  }
   0x7   : > { %v916_v2 = vld [vmem:[%s1183_s1 + $0xc0] sm:$0xff] (!%p138_p2)   ;;  %840 = vmatpush3.bf16.msra.mxu0 (!%p138_p2), %v915_v1  ;;  %v920_v6 = vld [vmem:[%s1183_s1 + $0xc8] sm:$0xff] (!%p138_p2)   ;;  %v924_v10 = vld [vmem:[%s1183_s1 + $0xd0] sm:$0xff] (!%p138_p2)  }
   0x8   : > { %v917_v3 = vld [vmem:[%s1183_s1 + $0x80] sm:$0xff] (!%p138_p2)   ;;  %861 = vmatprep.subr.bf16.mxu1 (!%p138_p2), %v916_v2  ;;  %841 = vmatprep.subr.bf16.mxu0 (!%p138_p2), %v918_v4  ;;  %v921_v7 = vld [vmem:[%s1183_s1 + $0x88] sm:$0xff] (!%p138_p2)   ;;  %v925_v11 = vld [vmem:[%s1183_s1 + $0x90] sm:$0xff] (!%p138_p2)  }
   0x9   : > { %862 = vmatpush3.bf16.msra.mxu1 (!%p138_p2), %v917_v3  ;;  %v926_v12 = vld [vmem:[%s1183_s1 + $0x58] sm:$0xff] (!%p138_p2)   ;;  %v930_v16 = vld [vmem:[%s1183_s1 + $0x60] sm:$0xff] (!%p138_p2)   ;;  %v934_v20 = vld [vmem:[%s1183_s1 + $0x68] sm:$0xff] (!%p138_p2)  }
   0xa   : > { %863 = vmatprep.subr.bf16.mxu1 (!%p138_p2), %v920_v6  ;;  %v927_v13 = vld [vmem:[%s1183_s1 + $0x18] sm:$0xff] (!%p138_p2)   ;;  %v931_v17 = vld [vmem:[%s1183_s1 + $0x20] sm:$0xff] (!%p138_p2)   ;;  %v935_v21 = vld [vmem:[%s1183_s1 + $0x28] sm:$0xff] (!%p138_p2)  }
   0xb   : > { %842 = vmatpush3.bf16.msra.mxu0 (!%p138_p2), %v919_v5  ;;  %v928_v14 = vld [vmem:[%s1183_s1 + $0xd8] sm:$0xff] (!%p138_p2)   ;;  %v932_v18 = vld [vmem:[%s1183_s1 + $0xe0] sm:$0xff] (!%p138_p2)   ;;  %v936_v22 = vld [vmem:[%s1183_s1 + $0xe8] sm:$0xff] (!%p138_p2)  }
   0xc   : > { %843 = vmatprep.subr.bf16.mxu0 (!%p138_p2), %v922_v8  ;;  %v929_v15 = vld [vmem:[%s1183_s1 + $0x98] sm:$0xff] (!%p138_p2)   ;;  %v933_v19 = vld [vmem:[%s1183_s1 + $0xa0] sm:$0xff] (!%p138_p2)   ;;  %v937_v23 = vld [vmem:[%s1183_s1 + $0xa8] sm:$0xff] (!%p138_p2)  }
   0xd   : > { %864 = vmatpush3.bf16.msra.mxu1 %v921_v7  ;;  %s1187_s13 = smov (!%p161_p3, %s774_s13), 1  ;;  %v938_v24 = vld [vmem:[%s1183_s1 + $0x70] sm:$0xff]   ;;  %v942_v28 = vld [vmem:[%s1183_s1 + $0x78] sm:$0xff]   ;;  %v949_v34 = vld [vmem:[%s1183_s1 + $0x140] sm:$0xff]  }
   0xe   : > { %865 = vmatprep.subr.bf16.mxu1 %v924_v10  ;;  %s905_s14 = smul.u32 48, %s1187_s13  ;;  %v939_v25 = vld [vmem:[%s1183_s1 + $0x30] sm:$0xff]   ;;  %v943_v29 = vld [vmem:[%s1183_s1 + $0x38] sm:$0xff]   ;;  %v953_v37 = vld [vmem:[%s1183_s1 + $0x100] sm:$0xff]  }
   0xf   : > { %844 = vmatpush3.bf16.msra.mxu0 %v923_v9  ;;  %v940_v26 = vld [vmem:[%s1183_s1 + $0xf0] sm:$0xff]   ;;  %v944_v30 = vld [vmem:[%s1183_s1 + $0xf8] sm:$0xff]   ;;  %v954_v38 = vld [vmem:[%s1183_s1 + $0x148] sm:$0xff]  }
  0x10   : > { %845 = vmatprep.subr.bf16.mxu0 %v926_v12  ;;  %v941_v27 = vld [vmem:[%s1183_s1 + $0xb0] sm:$0xff]   ;;  %s1104_s25 = scalar_lea.vmem %s1182_s0, %s905_s14  ;;  %v948_v33 = vld [vmem:[%s1183_s1 + $0xb8] sm:$0xff]   ;;  %v955_v39 = vld [vmem:[%s1183_s1 + $0x108] sm:$0xff]  }
  0x11   : > { %866 = vmatpush3.bf16.msra.mxu1 %v925_v11  ;;  %v945_v31 = vld [vmem:[%s1104_s25] ss:$24 sps:$4 sm:$0x1f]   ;;  %v947_v32 = vld [vmem:[%s1104_s25 + $0x4] ss:$24 sps:$4 sm:$0x1f]  }
  0x12   : > { %867 = vmatprep.subr.bf16.mxu1 %v928_v14  ;;  %626 = vmatprep.mubr.bf16.mxu0 %v947_v32  ;;  %v950_v35 = vld [vmem:[%s1104_s25 + $0x8] ss:$24 sps:$4 sm:$0x1f]   ;;  %v952_v36 = vld [vmem:[%s1104_s25 + $0xc] ss:$24 sps:$4 sm:$0x1f]  }
  0x13   : > { %846 = vmatpush3.bf16.msra.mxu0 %v927_v13  ;;  %667 = vmatprep.mubr.bf16.mxu1 %v952_v36  ;;  %v956_v40 = vld [vmem:[%s1183_s1 + $0x150] sm:$0xff]   ;;  %v958_v42 = vld [vmem:[%s1183_s1 + $0x158] sm:$0xff]   ;;  %v960_v44 = vld [vmem:[%s1183_s1 + $0x160] sm:$0xff]  }
  0x14   : > { %847 = vmatprep.subr.bf16.mxu0 %v930_v16  ;;  %v957_v41 = vld [vmem:[%s1183_s1 + $0x110] sm:$0xff]   ;;  %v959_v43 = vld [vmem:[%s1183_s1 + $0x118] sm:$0xff]   ;;  %v961_v45 = vld [vmem:[%s1183_s1 + $0x120] sm:$0xff]  }
  0x15   : > { %868 = vmatpush3.bf16.msra.mxu1 %v929_v15  ;;  %v962_v46 = vld [vmem:[%s1183_s1 + $0x168] sm:$0xff]   ;;  %v964_v49 = vld [vmem:[%s1183_s1 + $0x170] sm:$0xff]   ;;  %v966_v51 = vld [vmem:[%s1183_s1 + $0x178] sm:$0xff]  }
  0x16   : > { %869 = vmatprep.subr.bf16.mxu1 %v932_v18  ;;  %v970_v47 = vld [vmem:[%s1104_s25 + $0x14] ss:$24 sps:$4 sm:$0x1f]   ;;  %v967_v52 = vld [vmem:[%s1183_s1 + $0x138] sm:$0xff]   ;;  %v274_v55 = vld [vmem:[%s1184_s2] sm:$0xff] }
  0x17   : > { %848 = vmatpush3.bf16.msra.mxu0 %v931_v17  ;;  %v963_v48 = vld [vmem:[%s1183_s1 + $0x128] sm:$0xff]   ;;  %v965_v50 = vld [vmem:[%s1183_s1 + $0x130] sm:$0xff]  }
  0x18   : > { %849 = vmatprep.subr.bf16.mxu0 %v934_v20  ;;  %v968_v53 = vld [vmem:[%s1104_s25 + $0x10] ss:$24 sps:$4 sm:$0x1f]   ;;  %s838_s25 = sshll.u32 %s1187_s13, 4 }
  0x19   : > { %870 = vmatpush3.bf16.msra.mxu1 %v933_v19  ;;  %v275_v60 = vld [vmem:[%s1184_s2 + $0x8] sm:$0x3]  ;;  %s170_s21 = scalar_lea.vmem %s1185_s3, %s838_s25 }
  0x1a   : > { %871 = vmatprep.subr.bf16.mxu1 %v936_v22 }
  0x1b   : > { %850 = vmatpush3.bf16.msra.mxu0 %v935_v21 }
  0x1c   : > { %851 = vmatprep.subr.bf16.mxu0 %v938_v24 }
  0x1d   : > { %872 = vmatpush3.bf16.msra.mxu1 %v937_v23 }
  0x1e   : > { %873 = vmatprep.subr.bf16.mxu1 %v940_v26 }
  0x1f   : > { %852 = vmatpush3.bf16.msra.mxu0 %v939_v25 }
  0x20   : > { %853 = vmatprep.subr.bf16.mxu0 %v942_v28 }
  0x21   : > { %874 = vmatpush3.bf16.msra.mxu1 %v941_v27 }
  0x22   : > { %875 = vmatprep.subr.bf16.mxu1 %v944_v30 }
  0x23   : > { %854 = vmatpush3.bf16.msra.mxu0 %v943_v29 }
  0x24   : > { %883 = vmatprep.subr.bf16.mxu0 %v949_v34 }
  0x25   : > { %876 = vmatpush3.bf16.msra.mxu1 %v948_v33 }
  0x26   : > { %627 = vmatmul.mubr.bf16.vlgmr.msra.gmra.mrb[0].mxu0 %v945_v31 }
  0x27   : > { %884 = vmatpush3.bf16.msra.mxu0 %v953_v37  ;;  %708 = vmatprep.mubr.bf16.mxu0 %v970_v47 }
  0x28   : > { %668 = vmatmul.mubr.bf16.vlgmr.msra.gmra.mrb[0].mxu1 %v950_v35  ;;  %885 = vmatprep.subr.bf16.mxu0 %v954_v38 }
  0x2b   : > { %886 = vmatpush3.bf16.msra.mxu0 %v955_v39 }
  0x2c   : > { %887 = vmatprep.subr.bf16.mxu0 %v956_v40 }
  0x2f   : > { %888 = vmatpush3.bf16.msra.mxu0 %v957_v41 }
  0x30   : > { %889 = vmatprep.subr.bf16.mxu0 %v958_v42 }
  0x33   : > { %890 = vmatpush3.bf16.msra.mxu0 %v959_v43 }
  0x34   : > { %891 = vmatprep.subr.bf16.mxu0 %v960_v44 }
  0x37   : > { %892 = vmatpush3.bf16.msra.mxu0 %v961_v45 }
  0x38   : > { %893 = vmatprep.subr.bf16.mxu0 %v962_v46 }
  0x3b   : > { %894 = vmatpush3.bf16.msra.mxu0 %v963_v48 }
  0x3c   : > { %895 = vmatprep.subr.bf16.mxu0 %v964_v49 }
  0x3f   : > { %896 = vmatpush3.bf16.msra.mxu0 %v965_v50 }
  0x40   : > { %897 = vmatprep.subr.bf16.mxu0 %v966_v51 }
  0x43   : > { %898 = vmatpush3.bf16.msra.mxu0 %v967_v52 }
  0x46   : > { %709 = vmatmul.mubr.bf16.vlgmr.msra.gmra.mrb[4].mxu0 %v968_v53 }
  0xf9   : > { %v855_v54 = vpop.f32.mrb[0].mxu0 }
  0xfa   : > { %v856_v56 = vpop.f32.mrb[1].mxu0 }
  0xfb   : > { %v857_v57 = vadd.f32 %v856_v56, %v855_v54  ;;  %v858_v58 = vpop.f32.mrb[2].mxu0  ;;  %v877_v59 = vpop.f32.mrb[0].mxu1 }
  0xfc   : > { %v859_v61 = vpop.f32.mrb[3].mxu0  ;;  %v878_v0 = vpop.f32.mrb[1].mxu1 }
  0xfd   : > { %v629_v62 = vadd.f32 %v857_v57, %v274_v55  ;;  %v860_v63 = vadd.f32 %v859_v61, %v858_v58  ;;  %v879_v1 = vadd.f32 %v878_v0, %v877_v59  ;;  %v880_v2 = vpop.f32.mrb[2].mxu1 }
  0xfe   : > { %v881_v4 = vpop.f32.mrb[3].mxu1 }
  0xff   : > { %v632_v3 = vadd.f32 %v860_v63, %v275_v60  ;;  %v670_v5 = vadd.f32 %v879_v1, %v629_v62  ;;  %v882_v6 = vadd.f32 %v881_v4, %v880_v2 }
 0x101   : > { %v673_v7 = vadd.f32 %v882_v6, %v632_v3 }
 0x119   : > { %v899_v8 = vpop.f32.mrb[4].mxu0 }
 0x11a   : > { %v900_v9 = vpop.f32.mrb[5].mxu0 }
 0x11b   : > { %v901_v10 = vadd.f32 %v900_v9, %v899_v8  ;;  %v902_v11 = vpop.f32.mrb[6].mxu0 }
 0x11c   : > { %v903_v12 = vpop.f32.mrb[7].mxu0 }
 0x11d   : > { %v711_v13 = vadd.f32 %v901_v10, %v670_v5  ;;  %v904_v14 = vadd.f32 %v903_v12, %v902_v11 }
 0x11f   : > { %717 = vst [vmem:[%s170_s21] sm:$0xff] %v711_v13  ;;  %v714_v15 = vadd.f32 %v904_v14, %v673_v7 }
 0x121   : > { %718 = vst [vmem:[%s170_s21 + $0x8] sm:$0x3] %v714_v15 }
 0x122 PF: > { %s13_s12 = sadd.s32 1, %s977_s12  }
 0x123   : > { %p10_p4 = scmp.ge.s32.totalorder %s13_s12, 4  }
 0x125   :  { %12 = sbr.rel (!%p10_p4) target bundleno = 1 (0x1), region = 62 }

</bundles_post_ra>
